<compile_context>
chip_gen: v7x
topology: tpu7x:2x2x1
jax: 0.10.0
libtpu: 0.0.40
codegen_flags: <defaults>
</compile_context>

<pallas_src>
import functools

import jax
import jax.numpy as jnp
import numpy as np
from jax.experimental import pallas as pl
from jax.experimental.pallas import tpu as pltpu

LN_EPS = 1e-6
_TARGET_ROWS = 512          # token rows per grid step to amortize per-step overhead
_NEG_INF = -1e30


# --------------------------------------------------------------------------------------
# Hardware-aware knobs
# --------------------------------------------------------------------------------------
@functools.lru_cache(maxsize=None)
def _vmem_limit_bytes():
    """Generation-aware scoped-VMEM limit: ~3/4 of physical, capped at 100 MiB."""
    cap = 128 * 1024 * 1024
    try:
        cap = int(pltpu.get_tpu_info().vmem_capacity_bytes)
    except Exception:
        pass
    return min(cap * 3 // 4, 100 * 1024 * 1024)


def _probe_copy_kernel(x_ref, o_ref):
    o_ref[...] = x_ref[...]


@functools.lru_cache(maxsize=None)
def _single_buffer_ok():
    """True iff pipeline_mode=pl.Buffered(1) compiles & runs on this jax/backend."""
    if not hasattr(pl, "Buffered"):
        return False
    try:
        fn = pl.pallas_call(
            _probe_copy_kernel,
            out_shape=jax.ShapeDtypeStruct((8, 128), jnp.float32),
            grid=(1,),
            in_specs=[pl.BlockSpec((8, 128), lambda i: (0, 0),
                                   pipeline_mode=pl.Buffered(1))],
            out_specs=pl.BlockSpec((8, 128), lambda i: (0, 0)),
        )
        jax.block_until_ready(fn(jnp.zeros((8, 128), jnp.float32)))
        return True
    except Exception:
        return False


def _const_spec(shape):
    """Grid-invariant (weight/bias) BlockSpec; single-buffered when supported."""
    index_map = lambda i: (0,) * len(shape)
    if _single_buffer_ok():
        return pl.BlockSpec(shape, index_map, pipeline_mode=pl.Buffered(1))
    return pl.BlockSpec(shape, index_map)


# --------------------------------------------------------------------------------------
# Pallas kernels
# --------------------------------------------------------------------------------------
def _transformer_stack_kernel(
    x_ref,                      # (bb, S, D)  stack input (only read at layer 0)
    ln1w_ref, ln1b_ref,         # (1, D) f32
    wqkv_ref, bqkv_ref,         # (D, 3D) bf16, (1, 3D) f32
    wo_ref, bo_ref,             # (D, D)  bf16, (1, D)  f32
    ln2w_ref, ln2b_ref,         # (1, D) f32
    w1_ref, b1_ref,             # (D, M) bf16, (1, M) f32
    w2_ref, b2_ref,             # (M, D) bf16, (1, D) f32
    o_ref,                      # (bb, S, D)  bf16 output (written on the last layer)
    carry_ref,                  # (bb, S, D)  f32 VMEM scratch: layer-to-layer activation
    *, num_heads, s_valid,
):
    layer = pl.program_id(1)

    @pl.when(layer == 0)
    def _():
        carry_ref[...] = x_ref[...].astype(jnp.float32)

    e = carry_ref[...]                                 # (bb, S, D) f32
    bb, S, D = e.shape
    H = num_heads
    hd = D // H
    rows = bb * S
    scale = 1.0 / float(np.sqrt(hd))
    ef = e.reshape(rows, D)                            # lane-dense row matrix

    # ---------------- LayerNorm 1 (f32 statistics) ----------------
    mu = jnp.mean(ef, axis=-1, keepdims=True)
    var = jnp.mean((ef - mu) ** 2, axis=-1, keepdims=True)
    xn = (ef - mu) * jax.lax.rsqrt(var + LN_EPS)
    xn = xn * ln1w_ref[...] + ln1b_ref[...]

    # ---------------- fused QKV projection (bf16 MXU, f32 accum) ----------------
    qkv = jnp.dot(xn.astype(jnp.bfloat16), wqkv_ref[...],
                  preferred_element_type=jnp.float32) + bqkv_ref[...]
    qkv_bf = qkv.astype(jnp.bfloat16)                  # single wide cast, not 3*H narrow ones

    def heads(t):                                      # (rows, D) -> (bb*H, S, hd)
        return (t.reshape(bb, S, H, hd)                # head-major channel blocks (PyTorch MHA)
                 .transpose(0, 2, 1, 3)
                 .reshape(bb * H, S, hd))

    q = heads(qkv_bf[:, 0:D])
    k = heads(qkv_bf[:, D:2 * D])
    v = heads(qkv_bf[:, 2 * D:3 * D])

    # ---------------- multi-head self-attention (all heads in one batched matmul) ----------------
    # TODO(synk): switch to a KV-tiled online-softmax loop before scaling seq_length;
    #             the (bb*H, S, S) score tensor is O(S^2) VMEM.
    s = jnp.einsum("bqd,bkd->bqk", q, k, preferred_element_type=jnp.float32) * scale
    if s_valid < S:                                    # mask padded key tokens
        key_pos = jax.lax.broadcasted_iota(jnp.int32, (1, 1, S), 2)
        s = jnp.where(key_pos < s_valid, s, _NEG_INF)
    m = jnp.max(s, axis=-1, keepdims=True)
    p = jnp.exp(s - m)
    p = p * pl.reciprocal(jnp.sum(p, axis=-1, keepdims=True), approx=True)
    ctx = jnp.einsum("bqk,bkd->bqd", p.astype(jnp.bfloat16), v,
                     preferred_element_type=jnp.float32)           # (bb*H, S, hd)
    ctx = (ctx.reshape(bb, H, S, hd)
              .transpose(0, 2, 1, 3)
              .reshape(rows, D))

    attn = jnp.dot(ctx.astype(jnp.bfloat16), wo_ref[...],
                   preferred_element_type=jnp.float32) + bo_ref[...]
    x_res = attn + ef                                  # residual with the layer input

    # ---------------- LayerNorm 2 ----------------
    mu2 = jnp.mean(x_res, axis=-1, keepdims=True)
    var2 = jnp.mean((x_res - mu2) ** 2, axis=-1, keepdims=True)
    yn = (x_res - mu2) * jax.lax.rsqrt(var2 + LN_EPS)
    yn = yn * ln2w_ref[...] + ln2b_ref[...]

    # ---------------- MLP: Linear -> GELU -> Linear ----------------
    # TODO(synk): for MAE-base on v7x, N-tile w1 columns / w2 rows over an extra
    #             'arbitrary' grid axis instead of keeping both fully resident.
    h1 = jnp.dot(yn.astype(jnp.bfloat16), w1_ref[...],
                 preferred_element_type=jnp.float32) + b1_ref[...]
    # TODO(synk): PyTorch nn.GELU defaults to the exact erf form; tanh-approx differs ~1e-3.
    h1 = jax.nn.gelu(h1, approximate=True)
    y = jnp.dot(h1.astype(jnp.bfloat16), w2_ref[...],
                preferred_element_type=jnp.float32) + b2_ref[...]

    out = (x_res + y).reshape(bb, S, D)
    if s_valid < S:                                    # keep padded rows exactly zero
        row_pos = jax.lax.broadcasted_iota(jnp.int32, (1, S, 1), 1)
        out = jnp.where(row_pos < s_valid, out, 0.0)
    carry_ref[...] = out

    @pl.when(layer == pl.num_programs(1) - 1)
    def _():
        o_ref[...] = out.astype(o_ref.dtype)


def _ln_linear_kernel(x_ref, lnw_ref, lnb_ref, w_ref, b_ref, o_ref):
    x = x_ref[...].astype(jnp.float32)
    mu = jnp.mean(x, axis=-1, keepdims=True)
    var = jnp.mean((x - mu) ** 2, axis=-1, keepdims=True)
    xn = (x - mu) * jax.lax.rsqrt(var + LN_EPS)
    xn = xn * lnw_ref[...] + lnb_ref[...]
    o_ref[...] = (jnp.dot(xn.astype(jnp.bfloat16), w_ref[...],
                          preferred_element_type=jnp.float32) + b_ref[...]).astype(o_ref.dtype)


def _linear_kernel(x_ref, w_ref, b_ref, o_ref):
    x = x_ref[...].astype(jnp.bfloat16)
    o_ref[...] = (jnp.dot(x, w_ref[...],
                          preferred_element_type=jnp.float32) + b_ref[...]).astype(o_ref.dtype)


# --------------------------------------------------------------------------------------
# Pallas wrappers
# --------------------------------------------------------------------------------------
def _pick_batch_block(B, S):
    """Largest divisor of B with bb*S <= target rows AND >=2 grid steps (v7x megacore)."""
    target = max(_TARGET_ROWS, S)
    bb = 1
    for cand in range(1, B + 1):
        if B % cand == 0 and cand * S <= target and B // cand >= min(2, B):
            bb = cand
    return bb


def transformer_stack_pallas(x, blocks, num_heads):
    """Run an entire list of transformer blocks in a single pallas_call."""
    B, S, D = x.shape
    L = len(blocks)
    M = blocks[0]["w1"].shape[1]
    H = num_heads

    S_pad = max(8, ((S + 7) // 8) * 8)          # sublane-align the token axis
    if S_pad != S:
        x = jnp.pad(x, ((0, 0), (0, S_pad - S), (0, 0)))
    bb = _pick_batch_block(B, S_pad)

    stacked = {key: jnp.stack([blk[key] for blk in blocks], axis=0) for key in blocks[0]}

    kernel = functools.partial(_transformer_stack_kernel, num_heads=H, s_valid=S)

    def _wspec(*dims):                           # per-layer weight block, squeezed L dim
        return pl.BlockSpec((None,) + dims, lambda b, l: (l,) + (0,) * len(dims))

    grid_spec = pltpu.PrefetchScalarGridSpec(
        num_scalar_prefetch=0,
        grid=(B // bb, L),
        in_specs=[
            pl.BlockSpec((bb, S_pad, D), lambda b, l: (b, 0, 0)),
            _wspec(1, D), _wspec(1, D),                  # ln1
            _wspec(D, 3 * D), _wspec(1, 3 * D),          # qkv in-proj
            _wspec(D, D), _wspec(1, D),                  # attn out-proj
            _wspec(1, D), _wspec(1, D),                  # ln2
            _wspec(D, M), _wspec(1, M),                  # mlp linear_1
            _wspec(M, D), _wspec(1, D),                  # mlp linear_2
        ],
        out_specs=pl.BlockSpec((bb, S_pad, D), lambda b, l: (b, 0, 0)),
        scratch_shapes=[pltpu.VMEM((bb, S_pad, D), jnp.float32)],
    )

    rows = B * S_pad
    flops = L * (rows * (2 * D * 3 * D + 2 * D * D + 4 * D * M)
                 + 4 * B * H * S_pad * S_pad * (D // H))
    trans = L * (B * H * S_pad * S_pad + rows * M)
    bytes_acc = (rows * D * (4 + 2)
                 + L * 2 * (D * 3 * D + D * D + 2 * D * M)
                 + L * 4 * (9 * D + M))

    out = pl.pallas_call(
        kernel,
        out_shape=jax.ShapeDtypeStruct((B, S_pad, D), jnp.bfloat16),   # bf16 HBM traffic
        grid_spec=grid_spec,
        compiler_params=pltpu.CompilerParams(
            dimension_semantics=("parallel", "arbitrary"),
            vmem_limit_bytes=_vmem_limit_bytes()),
        cost_estimate=pl.CostEstimate(flops=int(flops), transcendentals=int(trans),
                                      bytes_accessed=int(bytes_acc)),
    )(x,
      stacked["ln1_w"], stacked["ln1_b"],
      stacked["wqkv"], stacked["bqkv"],
      stacked["wo"], stacked["bo"],
      stacked["ln2_w"], stacked["ln2_b"],
      stacked["w1"], stacked["b1"],
      stacked["w2"], stacked["b2"])
    return out[:, :S, :]


def _row_tile(R):
    for t in (512, 256):
        if R >= t:
            return t
    return max(8, ((R + 7) // 8) * 8)            # small R: one sublane-aligned block


def ln_linear_pallas(x, lnw, lnb, w, b):
    lead = x.shape[:-1]
    Din = x.shape[-1]
    Dout = w.shape[1]
    x2 = x.reshape(-1, Din)
    R = x2.shape[0]
    tr = _row_tile(R)
    R_pad = ((R + tr - 1) // tr) * tr            # pad (never a full-extent odd block)
    if R_pad != R:
        x2 = jnp.pad(x2, ((0, R_pad - R), (0, 0)))
    out = pl.pallas_call(
        _ln_linear_kernel,
        out_shape=jax.ShapeDtypeStruct((R_pad, Dout), jnp.float32),
        grid_spec=pltpu.PrefetchScalarGridSpec(
            num_scalar_prefetch=0,
            grid=(R_pad // tr,),
            in_specs=[pl.BlockSpec((tr, Din), lambda i: (i, 0)),
                      _const_spec((1, Din)), _const_spec((1, Din)),
                      _const_spec((Din, Dout)), _const_spec((1, Dout))],
            out_specs=pl.BlockSpec((tr, Dout), lambda i: (i, 0)),
        ),
        compiler_params=pltpu.CompilerParams(
            dimension_semantics=("parallel",),
            vmem_limit_bytes=_vmem_limit_bytes()),
        cost_estimate=pl.CostEstimate(
            flops=2 * R_pad * Din * Dout, transcendentals=0,
            bytes_accessed=4 * R_pad * (Din + Dout) + 2 * Din * Dout),
    )(x2, lnw, lnb, w, b)
    return out[:R].reshape(*lead, Dout)


def linear_pallas(x, w, b):
    lead = x.shape[:-1]
    Din = x.shape[-1]
    Dout = w.shape[1]
    x2 = x.reshape(-1, Din)
    R = x2.shape[0]
    tr = _row_tile(R)
    R_pad = ((R + tr - 1) // tr) * tr
    if R_pad != R:
        x2 = jnp.pad(x2, ((0, R_pad - R), (0, 0)))
    out = pl.pallas_call(
        _linear_kernel,
        out_shape=jax.ShapeDtypeStruct((R_pad, Dout), jnp.float32),
        grid_spec=pltpu.PrefetchScalarGridSpec(
            num_scalar_prefetch=0,
            grid=(R_pad // tr,),
            in_specs=[pl.BlockSpec((tr, Din), lambda i: (i, 0)),
                      _const_spec((Din, Dout)), _const_spec((1, Dout))],
            out_specs=pl.BlockSpec((tr, Dout), lambda i: (i, 0)),
        ),
        compiler_params=pltpu.CompilerParams(
            dimension_semantics=("parallel",),
            vmem_limit_bytes=_vmem_limit_bytes()),
        cost_estimate=pl.CostEstimate(
            flops=2 * R_pad * Din * Dout, transcendentals=0,
            bytes_accessed=4 * R_pad * (Din + Dout) + 2 * Din * Dout),
    )(x2, w, b)
    return out[:R].reshape(*lead, Dout)


# --------------------------------------------------------------------------------------
# Pure-JAX references (same bf16 matmul precision as the kernels)
# --------------------------------------------------------------------------------------
def _mm_bf16(a, w):
    return jnp.dot(a.astype(jnp.bfloat16), w.astype(jnp.bfloat16),
                   preferred_element_type=jnp.float32)


def _layernorm(x, w, b):
    mu = jnp.mean(x, axis=-1, keepdims=True)
    var = jnp.mean((x - mu) ** 2, axis=-1, keepdims=True)
    return (x - mu) * jax.lax.rsqrt(var + LN_EPS) * w + b


def transformer_block_ref(x, p, num_heads):
    B, S, D = x.shape
    H = num_heads
    hd = D // H
    scale = 1.0 / float(np.sqrt(hd))
    xf = x.reshape(B * S, D)
    xn = _layernorm(xf, p["ln1_w"], p["ln1_b"])
    qkv = _mm_bf16(xn, p["wqkv"]) + p["bqkv"]

    def heads(t):
        return t.reshape(B, S, H, hd).transpose(0, 2, 1, 3)

    q, k, v = (heads(qkv[:, 0:D]), heads(qkv[:, D:2 * D]), heads(qkv[:, 2 * D:3 * D]))
    s = jnp.einsum("bhqd,bhkd->bhqk", q.astype(jnp.bfloat16), k.astype(jnp.bfloat16),
                   preferred_element_type=jnp.float32) * scale
    pa = jax.nn.softmax(s, axis=-1)
    ctx = jnp.einsum("bhqk,bhkd->bhqd", pa.astype(jnp.bfloat16), v.astype(jnp.bfloat16),
                     preferred_element_type=jnp.float32)
    ctx = ctx.transpose(0, 2, 1, 3).reshape(B * S, D)
    attn = _mm_bf16(ctx, p["wo"]) + p["bo"]
    x_res = attn + xf
    yn = _layernorm(x_res, p["ln2_w"], p["ln2_b"])
    h1 = jax.nn.gelu(_mm_bf16(yn, p["w1"]) + p["b1"], approximate=True)
    y = _mm_bf16(h1, p["w2"]) + p["b2"]
    return (x_res + y).reshape(B, S, D)


def transformer_stack_ref(x, blocks, num_heads):
    for blk in blocks:
        x = transformer_block_ref(x, blk, num_heads)
    return x


def ln_linear_ref(x, lnw, lnb, w, b):
    lead = x.shape[:-1]
    xn = _layernorm(x.reshape(-1, x.shape[-1]).astype(jnp.float32), lnw, lnb)
    return (_mm_bf16(xn, w) + b).reshape(*lead, w.shape[1])


def linear_ref(x, w, b):
    lead = x.shape[:-1]
    return (_mm_bf16(x.reshape(-1, x.shape[-1]), w) + b).reshape(*lead, w.shape[1])


# --------------------------------------------------------------------------------------
# MAE forward pipeline (shared between Pallas path and reference path)
# --------------------------------------------------------------------------------------
def patchify(eeg, patch_size):
    N, C, L = eeg.shape
    lf = L // patch_size
    x = eeg.reshape(N, C, lf, patch_size).transpose(0, 2, 3, 1)   # 'NClp->NlpC'
    return x.reshape(N, lf, patch_size * C)


def sine_cosine_pos_embed(seq_len, dim, class_token=False):
    omega = jnp.arange(dim // 2, dtype=jnp.float32) / (dim / 2.0)
    omega = 1.0 / (10000.0 ** omega)
    pos = jnp.arange(seq_len, dtype=jnp.float32)
    prod = jnp.einsum("l,d->ld", pos, omega)
    emb = jnp.concatenate([jnp.sin(prod), jnp.cos(prod)], axis=1)
    if class_token:
        emb = jnp.concatenate([jnp.zeros((1, dim), jnp.float32), emb], axis=0)
    return emb


def mae_forward(eeg, age, mask_noise, params, cfg, *, block_stack_fn, ln_linear_fn, linear_fn):
    del age  # TODO(synk): use_age in {'fc','conv','embedding'} not implemented (demo uses 'no').
    if cfg["use_age"] != "no":
        raise NotImplementedError("only use_age='no' is supported")

    N, C, L = eeg.shape
    psz = cfg["patch_size"]
    lf = L // psz
    l_keep = int(round(lf * (1.0 - cfg["mask_ratio"])))
    De, Dd = cfg["enc_dim"], cfg["dec_dim"]

    # ---- encoder ----
    xp = patchify(eeg, psz)                                          # (N, lf, psz*C)
    x = linear_fn(xp, params["enc_proj_w"], params["enc_proj_b"])    # Conv1d(k=stride=psz)
    x = x + params["enc_pos_embed"][:, 1:, :]

    # random masking (JAX wrapper level: RNG + argsort + gather are data dependent)
    idx_shuffle = jnp.argsort(mask_noise, axis=1)
    idx_restore = jnp.argsort(idx_shuffle, axis=1)
    idx_keep = idx_shuffle[:, :l_keep]
    x_masked = jnp.take_along_axis(
        x, jnp.broadcast_to(idx_keep[:, :, None], (N, l_keep, De)), axis=1)
    mask0 = jnp.broadcast_to(
        (jnp.arange(lf)[None, :] >= l_keep).astype(jnp.float32), (N, lf))
    mask = jnp.take_along_axis(mask0, idx_restore, axis=1)

    cls = params["class_token"] + params["enc_pos_embed"][:, :1, :]
    x = jnp.concatenate([jnp.broadcast_to(cls, (N, 1, De)), x_masked], axis=1)

    x = block_stack_fn(x, params["enc_blocks"], cfg["enc_heads"])

    # enc_norm + dec_proj (fused LN -> Linear)
    x = ln_linear_fn(x, params["enc_norm_w"], params["enc_norm_b"],
                     params["dec_proj_w"], params["dec_proj_b"])     # (N, l_keep+1, Dd)

    # ---- decoder ----
    cls_tok = x[:, :1, :]
    vis = x[:, 1:, :]
    mask_tokens = jnp.broadcast_to(params["mask_token"], (N, lf - l_keep, Dd))
    full = jnp.concatenate([vis, mask_tokens], axis=1)
    full = jnp.take_along_axis(
        full, jnp.broadcast_to(idx_restore[:, :, None], (N, lf, Dd)), axis=1)
    x = jnp.concatenate([cls_tok, full], axis=1) + params["dec_pos_embed"]

    x = block_stack_fn(x, params["dec_blocks"], cfg["dec_heads"])

    # dec_norm + decoder_pred fused; LN is per-token so LN(x)[:,1:] == LN(x[:,1:]).
    pred = ln_linear_fn(x[:, 1:, :], params["dec_norm_w"], params["dec_norm_b"],
                        params["dec_pred_w"], params["dec_pred_b"])  # (N, lf, psz*C)

    # ---- reconstruction loss ----
    desired = patchify(eeg, psz)
    if cfg.get("norm_pix_loss", False):
        mean = jnp.mean(desired, axis=-1, keepdims=True)
        var = jnp.var(desired, axis=-1, keepdims=True, ddof=1)
        desired = (desired - mean) / jnp.sqrt(var + 1e-6)
    diff = desired - pred
    lt = cfg.get("loss_type", "mse")
    if lt == "mse":
        loss_el = jnp.mean(diff ** 2, axis=-1)
    elif lt == "mae":
        loss_el = jnp.mean(jnp.abs(diff), axis=-1)
    else:  # smooth-l1
        ad = jnp.abs(diff)
        loss_el = jnp.mean(jnp.where(ad < 1.0, 0.5 * ad ** 2, ad - 0.5), axis=-1)
    # NOTE: the PyTorch module's forward() passes idx_restore (not mask) as the loss
    # weighting -- mirrored faithfully here (likely an upstream bug, kept for parity).
    w = idx_restore.astype(jnp.float32)
    loss = jnp.sum(loss_el * w) / jnp.sum(w)
    return loss, pred, mask, idx_restore


# --------------------------------------------------------------------------------------
# Parameter construction
# --------------------------------------------------------------------------------------
def make_block_params(key, D, M):
    ks = jax.random.split(key, 12)

    def w_bf16(k, fan_in, shape):
        return (jax.random.normal(k, shape, jnp.float32) / np.sqrt(fan_in)).astype(jnp.bfloat16)

    return {
        "ln1_w": 1.0 + 0.05 * jax.random.normal(ks[0], (1, D), jnp.float32),
        "ln1_b": 0.05 * jax.random.normal(ks[1], (1, D), jnp.float32),
        "wqkv": w_bf16(ks[2], D, (D, 3 * D)),
        "bqkv": 0.02 * jax.random.normal(ks[3], (1, 3 * D), jnp.float32),
        "wo": w_bf16(ks[4], D, (D, D)),
        "bo": 0.02 * jax.random.normal(ks[5], (1, D), jnp.float32),
        "ln2_w": 1.0 + 0.05 * jax.random.normal(ks[6], (1, D), jnp.float32),
        "ln2_b": 0.05 * jax.random.normal(ks[7], (1, D), jnp.float32),
        "w1": w_bf16(ks[8], D, (D, M)),
        "b1": 0.02 * jax.random.normal(ks[9], (1, M), jnp.float32),
        "w2": w_bf16(ks[10], M, (M, D)),
        "b2": 0.02 * jax.random.normal(ks[11], (1, D), jnp.float32),
    }


def make_mae_params(key, cfg):
    De, Dd = cfg["enc_dim"], cfg["dec_dim"]
    psz, C = cfg["patch_size"], cfg["in_channels"]
    lf = cfg["seq_length"] // psz
    Me = int(round(De * cfg["mlp_ratio"]))
    Md = int(round(Dd * cfg["mlp_ratio"]))
    keys = iter(jax.random.split(key, 20 + cfg["enc_depth"] + cfg["dec_depth"]))

    def w_bf16(k, fan_in, shape):
        return (jax.random.normal(k, shape, jnp.float32) / np.sqrt(fan_in)).astype(jnp.bfloat16)

    # Conv1d(C, De, kernel=psz, stride=psz) weight (De, C, psz) folded to a (psz*C, De)
    # matmul over the patchified input (patch index layout t*C + c, matching patchify()).
    conv_w = jax.random.normal(next(keys), (De, C, psz), jnp.float32) / np.sqrt(C * psz)
    params = {
        "enc_proj_w": conv_w.transpose(2, 1, 0).reshape(psz * C, De).astype(jnp.bfloat16),
        "enc_proj_b": 0.02 * jax.random.normal(next(keys), (1, De), jnp.float32),
        "class_token": 0.02 * jax.random.normal(next(keys), (1, 1, De), jnp.float32),
        "mask_token": 0.02 * jax.random.normal(next(keys), (1, 1, Dd), jnp.float32),
        "enc_pos_embed": sine_cosine_pos_embed(lf, De, class_token=True)[None],
        "dec_pos_embed": sine_cosine_pos_embed(lf, Dd, class_token=True)[None],
        "enc_norm_w": 1.0 + 0.05 * jax.random.normal(next(keys), (1, De), jnp.float32),
        "enc_norm_b": 0.05 * jax.random.normal(next(keys), (1, De), jnp.float32),
        "dec_norm_w": 1.0 + 0.05 * jax.random.normal(next(keys), (1, Dd), jnp.float32),
        "dec_norm_b": 0.05 * jax.random.normal(next(keys), (1, Dd), jnp.float32),
        "dec_proj_w": w_bf16(next(keys), De, (De, Dd)),
        "dec_proj_b": 0.02 * jax.random.normal(next(keys), (1, Dd), jnp.float32),
        "dec_pred_w": w_bf16(next(keys), Dd, (Dd, psz * C)),
        "dec_pred_b": 0.02 * jax.random.normal(next(keys), (1, psz * C), jnp.float32),
    }
    params["enc_blocks"] = [make_block_params(next(keys), De, Me) for _ in range(cfg["enc_depth"])]
    params["dec_blocks"] = [make_block_params(next(keys), Dd, Md) for _ in range(cfg["dec_depth"])]
    return params


# --------------------------------------------------------------------------------------
if __name__ == "__main__":
    cfg = dict(
        seq_length=256, patch_size=16, in_channels=8, mask_ratio=0.5, use_age="no",
        enc_dim=128, enc_depth=2, enc_heads=4,
        dec_dim=128, dec_depth=2, dec_heads=4,
        mlp_ratio=2.0, norm_pix_loss=False, loss_type="mse",
    )
    N = 2
    lf = cfg["seq_length"] // cfg["patch_size"]

    key = jax.random.PRNGKey(0)
    k_eeg, k_age, k_noise, k_par = jax.random.split(key, 4)
    eeg = jax.random.normal(k_eeg, (N, cfg["in_channels"], cfg["seq_length"]), jnp.float32)
    age = jax.random.uniform(k_age, (N,), jnp.float32)
    mask_noise = jax.random.uniform(k_noise, (N, lf), jnp.float32)   # shared masking noise
    params = make_mae_params(k_par, cfg)

    loss, pred, mask, idx_restore = mae_forward(
        eeg, age, mask_noise, params, cfg,
        block_stack_fn=transformer_stack_pallas,
        ln_linear_fn=ln_linear_pallas,
        linear_fn=linear_pallas)
    loss = jax.block_until_ready(loss)
    pred = jax.block_until_ready(pred)

    loss_ref, pred_ref, _, _ = mae_forward(
        eeg, age, mask_noise, params, cfg,
        block_stack_fn=transformer_stack_ref,
        ln_linear_fn=ln_linear_ref,
        linear_fn=linear_ref)
    loss_ref = jax.block_until_ready(loss_ref)

    np.testing.assert_allclose(np.asarray(pred), np.asarray(pred_ref), rtol=3e-2, atol=3e-2)
    np.testing.assert_allclose(float(loss), float(loss_ref), rtol=3e-2, atol=3e-2)
    print("KERNEL_OK")
</pallas_src>

<mosaic_0001>
module attributes {stable_mosaic.version = 11 : i64} {
  func.func @_probe_copy_kernel(%arg0: i32, %arg1: memref<8x128xf32, #tpu.memory_space<vmem>>, %arg2: memref<8x128xf32, #tpu.memory_space<vmem>>) attributes {dimension_semantics = [#tpu.dimension_semantics<arbitrary>], iteration_bounds = array<i64: 1>, scalar_prefetch = 0 : i64, scratch_operands = 0 : i64, tpu.core_type = #tpu.core_type<tc>, window_params = [{pipeline_mode = #tpu.pipeline_mode<synchronous>, transform_indices = @transform_0, window_bounds = array<i64: 8, 128>}, {pipeline_mode = #tpu.pipeline_mode<synchronous>, transform_indices = @transform_1, window_bounds = array<i64: 8, 128>}]} {
    %c0 = arith.constant 0 : index
    %c0_0 = arith.constant 0 : index
    %0 = vector.load %arg1[%c0, %c0_0] : memref<8x128xf32, #tpu.memory_space<vmem>>, vector<8x128xf32>
    %c0_1 = arith.constant 0 : index
    %c0_2 = arith.constant 0 : index
    %1 = vector.load %arg2[%c0_1, %c0_2] : memref<8x128xf32, #tpu.memory_space<vmem>>, vector<8x128xf32>
    tpu.vector_store %arg2[%c0_1, %c0_2], %0 {strides = array<i32>} : memref<8x128xf32, #tpu.memory_space<vmem>>, vector<8x128xf32>,
    return
  }
  func.func @transform_0(%arg0: i32) -> (i32, i32) {
    %c0_i32 = arith.constant 0 : i32
    %c0_i32_0 = arith.constant 0 : i32
    %c0_i32_1 = arith.constant 0 : i32
    return %c0_i32, %c0_i32_0 : i32, i32
  }
  func.func @transform_1(%arg0: i32) -> (i32, i32) {
    %c0_i32 = arith.constant 0 : i32
    %c0_i32_0 = arith.constant 0 : i32
    %c0_i32_1 = arith.constant 0 : i32
    return %c0_i32, %c0_i32_0 : i32, i32
  }
}

module attributes {stable_mosaic.version = 11 : i64} {
  func.func @_linear_kernel(%arg0: i32, %arg1: memref<32x128xf32, #tpu.memory_space<vmem>>, %arg2: memref<128x128xbf16, #tpu.memory_space<vmem>>, %arg3: memref<1x128xf32, #tpu.memory_space<vmem>>, %arg4: memref<32x128xf32, #tpu.memory_space<vmem>>) attributes {dimension_semantics = [#tpu.dimension_semantics<parallel>], iteration_bounds = array<i64: 1>, scalar_prefetch = 0 : i64, scratch_operands = 0 : i64, tpu.core_type = #tpu.core_type<tc>, window_params = [{transform_indices = @transform_0, window_bounds = array<i64: 32, 128>}, {pipeline_mode = #tpu.pipeline_mode<synchronous>, transform_indices = @transform_1, window_bounds = array<i64: 128, 128>}, {pipeline_mode = #tpu.pipeline_mode<synchronous>, transform_indices = @transform_2, window_bounds = array<i64: 1, 128>}, {transform_indices = @transform_3, window_bounds = array<i64: 32, 128>}]} {
    %c0 = arith.constant 0 : index
    %c0_0 = arith.constant 0 : index
    %0 = vector.load %arg1[%c0, %c0_0] : memref<32x128xf32, #tpu.memory_space<vmem>>, vector<32x128xf32>
    %1 = arith.truncf %0 : vector<32x128xf32> to vector<32x128xbf16>
    %c0_1 = arith.constant 0 : index
    %c0_2 = arith.constant 0 : index
    %2 = vector.load %arg2[%c0_1, %c0_2] : memref<128x128xbf16, #tpu.memory_space<vmem>>, vector<128x128xbf16>
    %cst = arith.constant dense<0.000000e+00> : vector<32x128xf32>
    %3 = tpu.matmul %1, %2, %cst {dimension_numbers = #tpu.dot_dimension_numbers<[1], [0], [0], [1], [0, 0, 1, 1], [], []>} : vector<32x128xbf16>, vector<128x128xbf16>, vector<32x128xf32> -> vector<32x128xf32>
    %c0_3 = arith.constant 0 : index
    %c0_4 = arith.constant 0 : index
    %4 = vector.load %arg3[%c0_3, %c0_4] : memref<1x128xf32, #tpu.memory_space<vmem>>, vector<1x128xf32>
    %5 = vector.broadcast %4 : vector<1x128xf32> to vector<32x128xf32>
    %6 = arith.addf %3, %5 : vector<32x128xf32>
    %c0_5 = arith.constant 0 : index
    %c0_6 = arith.constant 0 : index
    %7 = vector.load %arg4[%c0_5, %c0_6] : memref<32x128xf32, #tpu.memory_space<vmem>>, vector<32x128xf32>
    tpu.vector_store %arg4[%c0_5, %c0_6], %6 {strides = array<i32>} : memref<32x128xf32, #tpu.memory_space<vmem>>, vector<32x128xf32>,
    return
  }
  func.func @transform_0(%arg0: i32) -> (i32, i32) {
    %c0_i32 = arith.constant 0 : i32
    %c0_i32_0 = arith.constant 0 : i32
    return %arg0, %c0_i32 : i32, i32
  }
  func.func @transform_1(%arg0: i32) -> (i32, i32) {
    %c0_i32 = arith.constant 0 : i32
    %c0_i32_0 = arith.constant 0 : i32
    %c0_i32_1 = arith.constant 0 : i32
    return %c0_i32, %c0_i32_0 : i32, i32
  }
  func.func @transform_2(%arg0: i32) -> (i32, i32) {
    %c0_i32 = arith.constant 0 : i32
    %c0_i32_0 = arith.constant 0 : i32
    %c0_i32_1 = arith.constant 0 : i32
    return %c0_i32, %c0_i32_0 : i32, i32
  }
  func.func @transform_3(%arg0: i32) -> (i32, i32) {
    %c0_i32 = arith.constant 0 : i32
    %c0_i32_0 = arith.constant 0 : i32
    return %arg0, %c0_i32 : i32, i32
  }
}

</mosaic_0001>

<bundles_post_ra>
// kernel: tpu_custom_call.1
= control target key start
LH: loop header
LB: loop body
LE: loop exit
PB: predicated region body
PF: predicated region fallthrough
CT: control target
= control target key end

     0   :  { %6 = vsyncpa [#allocation3], 0  ;;  %s124_s0 = inlined_call_operand.hbm [shape: f32[8,128], index: 0, kind: input, shape index: {}]   ;;  %s125_s1 = inlined_call_operand.hbm [shape: f32[8,128], index: 1, kind: output, shape index: {}]  }
   0x1   :  { %7 = vsyncpa [#allocation4], 0  ;;  %s88_s6 = smov [#allocation2]   ;;  %s40_s10 = scalar_lea.hbm %s124_s0, 128 }
   0x2   :  { %s14_s7 = sshll.u32 %s88_s6, 4  ;;  %p41_p0 = scmp.ne.s32.totalorder %s124_s0, %s40_s10  ;;  %s15_s7 = int_to_ptr.vmem [resolvable:$true] %s14_s7 }
   0x3   :  { %p44_p1 = scmp.lt.u32.totalorder %s40_s10, %s124_s0 }
   0x5   :  { %p46_p2 = pnand %p44_p1, %p41_p0 }
   0x7   :  { %49 = shalt.err (!%p46_p2)
}
   0x8   :  { %s50_s15 = scalar_lea.vmem %s15_s7, 128  ;;  %p55_p4 = scmp.lt.s32.totalorder %s15_s7, %s15_s7 }
   0x9   :  { %p51_p3 = scmp.ne.s32.totalorder %s15_s7, %s50_s15  ;;  %p56_p5 = scmp.lt.s32.totalorder %s50_s15, %s50_s15 }
   0xb   :  { %p57_p6 = por %p56_p5, %p55_p4 }
   0xd   :  { %p58_p7 = pnand %p57_p6, %p51_p3 }
   0xf   :  { %61 = shalt.err (!%p58_p7)
}
  0x10   :  { %17 = dma.hbm_to_vmem [thread:$0]  %s124_s0, 128, %s15_s7, [#allocation3]  }
  0x11   :  { %84 = dma.done.wait [#allocation3], 128  }
  0x12   :  { %85 = vsyncadd [#allocation3], 4294967168  ;;  %s89_s18 = smov [#allocation5]   ;;  %v21_v0 = vld [vmem:[#allocation2] sm:$0xff] }
  0x13   :  { %s29_s19 = sshll.u32 %s89_s18, 4  ;;  %22 = vst [vmem:[#allocation5] sm:$0xff] %v21_v0  ;;  %s30_s19 = int_to_ptr.vmem [resolvable:$true] %s29_s19 }
  0x14   :  { %s62_s20 = scalar_lea.vmem %s30_s19, 128  ;;  %p67_p9 = scmp.lt.s32.totalorder %s30_s19, %s30_s19 }
  0x15   :  { %p63_p8 = scmp.ne.s32.totalorder %s30_s19, %s62_s20  ;;  %p68_p10 = scmp.lt.s32.totalorder %s62_s20, %s62_s20 }
  0x17   :  { %p69_p11 = por %p68_p10, %p67_p9 }
  0x19   :  { %p70_p12 = pnand %p69_p11, %p63_p8 }
  0x1b   :  { %73 = shalt.err (!%p70_p12)
}
  0x1c   :  { %s74_s23 = scalar_lea.hbm %s125_s1, 128 }
  0x1d   :  { %p75_p13 = scmp.ne.s32.totalorder %s125_s1, %s74_s23  ;;  %p78_p0 = scmp.lt.u32.totalorder %s74_s23, %s125_s1 }
  0x1f   :  { %p80_p1 = pnand %p78_p0, %p75_p13 }
  0x21   :  { %83 = shalt.err (!%p80_p1)
}
  0x22   :  { %32 = dma.vmem_to_hbm [thread:$0]  %s30_s19, 128, %s125_s1, [#allocation4]  }
  0x23   :  { %86 = dma.done.wait [#allocation4], 128  }
  0x24   :  { %87 = vsyncadd [#allocation4], 4294967168 }
  0x25   :  { %36 = vsyncpa [#allocation3], 1 }
  0x26   :  { %37 = vsyncpa [#allocation4], 1 }

// kernel: tpu_custom_call.1
= control target key start
LH: loop header
LB: loop body
LE: loop exit
PB: predicated region body
PF: predicated region fallthrough
CT: control target
= control target key end

     0   :  { %8 = vsyncpa [#allocation3], 0  ;;  %s434_s0 = inlined_call_operand.hbm [shape: f32[32,128], index: 0, kind: input, shape index: {}]   ;;  %s435_s1 = inlined_call_operand.hbm [shape: bf16[128,128], index: 1, kind: input, shape index: {}]   ;;  %s436_s2 = inlined_call_operand.hbm [shape: f32[1,128], index: 2, kind: input, shape index: {}]   ;;  %s437_s3 = inlined_call_operand.hbm [shape: f32[32,128], index: 3, kind: output, shape index: {}]  }
   0x1   :  { %9 = vsyncpa [#allocation6], 0 }
   0x2   :  { %10 = vsyncpa [#allocation4], 0  ;;  %s352_s12 = smov [#allocation5]   ;;  %s258_s16 = scalar_lea.hbm %s435_s1, 1024 }
   0x3   :  { %s28_s13 = sshll.u32 %s352_s12, 4  ;;  %p259_p0 = scmp.ne.s32.totalorder %s435_s1, %s258_s16  ;;  %s29_s13 = int_to_ptr.vmem [resolvable:$true] %s28_s13 }
   0x4   :  { %p262_p1 = scmp.lt.u32.totalorder %s258_s16, %s435_s1 }
   0x6   :  { %p264_p2 = pnand %p262_p1, %p259_p0 }
   0x8   :  { %267 = shalt.err (!%p264_p2)
}
   0x9   :  { %s268_s21 = scalar_lea.vmem %s29_s13, 1024  ;;  %p273_p4 = scmp.lt.s32.totalorder %s29_s13, %s29_s13 }
   0xa   :  { %p269_p3 = scmp.ne.s32.totalorder %s29_s13, %s268_s21  ;;  %p274_p5 = scmp.lt.s32.totalorder %s268_s21, %s268_s21 }
   0xc   :  { %p275_p6 = por %p274_p5, %p273_p4 }
   0xe   :  { %p276_p7 = pnand %p275_p6, %p269_p3 }
  0x10   :  { %279 = shalt.err (!%p276_p7)
}
  0x11   :  { %s353_s22 = smov 64   ;;  %s354_s23 = smov 4  }
  0x12   :  { %34 = dma.hbm_to_vmem [thread:$0]  %s435_s1, 1024, %s29_s13, [#allocation6], %s353_s22, %s353_s22, %s354_s23  }
  0x13   :  { %s355_s26 = smov [#allocation2]   ;;  %s280_s30 = scalar_lea.hbm %s434_s0, 512 }
  0x14   :  { %s16_s27 = sshll.u32 %s355_s26, 4  ;;  %p281_p8 = scmp.ne.s32.totalorder %s434_s0, %s280_s30  ;;  %s17_s27 = int_to_ptr.vmem [resolvable:$true] %s16_s27 }
  0x15   :  { %p284_p9 = scmp.lt.u32.totalorder %s280_s30, %s434_s0 }
  0x17   :  { %p286_p10 = pnand %p284_p9, %p281_p8 }
  0x19   :  { %289 = shalt.err (!%p286_p10)
}
  0x1a   :  { %s290_s8 = scalar_lea.vmem %s17_s27, 512  ;;  %p295_p12 = scmp.lt.s32.totalorder %s17_s27, %s17_s27 }
  0x1b   :  { %p291_p11 = scmp.ne.s32.totalorder %s17_s27, %s290_s8  ;;  %p296_p13 = scmp.lt.s32.totalorder %s290_s8, %s290_s8 }
  0x1d   :  { %p297_p0 = por %p296_p13, %p295_p12 }
  0x1f   :  { %p298_p1 = pnand %p297_p0, %p291_p11 }
  0x21   :  { %301 = shalt.err (!%p298_p1)
}
  0x22   :  { %s356_s1 = smov 128   ;;  %s357_s9 = smov 8  }
  0x23   :  { %22 = dma.hbm_to_vmem [thread:$0]  %s434_s0, 512, %s17_s27, [#allocation3], %s356_s1, %s356_s1, %s357_s9  }
  0x24   :  { %s358_s12 = smov [#allocation7]   ;;  %s302_s16 = scalar_lea.hbm %s436_s2, 16 }
  0x25   :  { %s41_s13 = sshll.u32 %s358_s12, 4  ;;  %p303_p2 = scmp.ne.s32.totalorder %s436_s2, %s302_s16  ;;  %s42_s13 = int_to_ptr.vmem [resolvable:$true] %s41_s13 }
  0x26   :  { %p306_p3 = scmp.lt.u32.totalorder %s302_s16, %s436_s2 }
  0x28   :  { %p308_p4 = pnand %p306_p3, %p303_p2 }
  0x2a   :  { %311 = shalt.err (!%p308_p4)
}
  0x2b   :  { %s312_s21 = scalar_lea.vmem %s42_s13, 16  ;;  %s316_s0 = scalar_lea.vmem %s42_s13, 32 }
  0x2c   :  { %p313_p5 = scmp.ne.s32.totalorder %s42_s13, %s312_s21  ;;  %p317_p6 = scmp.lt.s32.totalorder %s42_s13, %s42_s13 }
  0x2d   :  { %p318_p7 = scmp.lt.s32.totalorder %s316_s0, %s312_s21 }
  0x2f   :  { %p319_p8 = por %p318_p7, %p317_p6 }
  0x31   :  { %p320_p9 = pnand %p319_p8, %p313_p5 }
  0x33   :  { %323 = shalt.err (!%p320_p9)
}
  0x34   :  { %44 = dma.hbm_to_vmem [thread:$0]  %s436_s2, 16, %s42_s13, [#allocation6]  }
  0x35   :  { %346 = dma.done.wait [#allocation3], 512  }
  0x36   :  { %347 = vsyncadd [#allocation3], 4294966784 }
  0x37   :  { %348 = dma.done.wait [#allocation6], 1040  }
  0x38   :  { %349 = vsyncadd [#allocation6], 4294966256  ;;  %v250_v0 = vld [vmem:[#allocation5] sm:$0xff]   ;;  %v251_v1 = vld [vmem:[#allocation5 + $0x8] sm:$0xff]   ;;  %s359_s2 = smov [#allocation8]  }
  0x39   :  { %222 = vmatprep.subr.bf16.mxu0 %v250_v0  ;;  %v252_v2 = vld [vmem:[#allocation5 + $0x10] sm:$0xff]   ;;  %v253_v3 = vld [vmem:[#allocation5 + $0x18] sm:$0xff]   ;;  %v55_v4 = vld [vmem:[#allocation2] sm:$0xff]  ;;  %s190_s24 = sshll.u32 %s359_s2, 4  ;;  %s191_s24 = int_to_ptr.vmem [resolvable:$true] %s190_s24 }
  0x3a   :  { %223 = vmatpush3.bf16.msra.mxu0 %v250_v0  ;;  %v56_v5 = vld [vmem:[#allocation2 + $0x8] sm:$0xff]  ;;  %v254_v7 = vld [vmem:[#allocation5 + $0x20] sm:$0xff]   ;;  %v256_v9 = vld [vmem:[#allocation5 + $0x30] sm:$0xff]   ;;  %s324_s25 = scalar_lea.vmem %s191_s24, 512  ;;  %p329_p11 = scmp.lt.s32.totalorder %s191_s24, %s191_s24 }
  0x3b   :  { %224 = vmatprep.subr.bf16.mxu0 %v251_v1  ;;  %v59_v6 = vpack.c.bf16 %v56_v5, %v55_v4  ;;  %v255_v8 = vld [vmem:[#allocation5 + $0x28] sm:$0xff]   ;;  %v257_v10 = vld [vmem:[#allocation5 + $0x38] sm:$0xff]   ;;  %v57_v11 = vld [vmem:[#allocation2 + $0x10] sm:$0xff]  ;;  %p325_p10 = scmp.ne.s32.totalorder %s191_s24, %s324_s25  ;;  %p330_p12 = scmp.lt.s32.totalorder %s324_s25, %s324_s25 }
  0x3c   :  { %v58_v12 = vld [vmem:[#allocation2 + $0x18] sm:$0xff]  ;;  %v203_v14 = vld [vmem:[#allocation7] ss:$0 sm:$0xff] }
  0x3d   :  { %238 = vmatprep.mubr.bf16.mxu0 %v59_v6  ;;  %v60_v13 = vpack.c.bf16 %v58_v12, %v57_v11  ;;  %p331_p13 = por %p330_p12, %p329_p11 }
  0x3e   :  { %225 = vmatpush3.bf16.msra.mxu0 %v251_v1 }
  0x3f   :  { %226 = vmatprep.subr.bf16.mxu0 %v252_v2  ;;  %p332_p0 = pnand %p331_p13, %p325_p10 }
  0x42   :  { %227 = vmatpush3.bf16.msra.mxu0 %v252_v2 }
  0x43   :  { %228 = vmatprep.subr.bf16.mxu0 %v253_v3 }
  0x46   :  { %229 = vmatpush3.bf16.msra.mxu0 %v253_v3 }
  0x47   :  { %230 = vmatprep.subr.bf16.mxu0 %v254_v7 }
  0x4a   :  { %231 = vmatpush3.bf16.msra.mxu0 %v254_v7 }
  0x4b   :  { %232 = vmatprep.subr.bf16.mxu0 %v255_v8 }
  0x4e   :  { %233 = vmatpush3.bf16.msra.mxu0 %v255_v8 }
  0x4f   :  { %234 = vmatprep.subr.bf16.mxu0 %v256_v9 }
  0x52   :  { %235 = vmatpush3.bf16.msra.mxu0 %v256_v9 }
  0x53   :  { %236 = vmatprep.subr.bf16.mxu0 %v257_v10 }
  0x56   :  { %237 = vmatpush3.bf16.msra.mxu0 %v257_v10 }
  0x59   :  { %239 = vmatmul.mubr.bf16.vlgmr.msra.gmra.mrb[0].mxu0 %v60_v13 }
 0x12c   :  { %v240_v15 = vpop.f32.mrb[0].mxu0 }
 0x12d   :  { %v175_v16 = vadd.f32 %v240_v15, %v203_v14  ;;  %v166_v17 = vpop.f32.mrb[1].mxu0 }
 0x12e   :  { %v167_v18 = vadd.f32 %v203_v14, %v166_v17  ;;  %v241_v19 = vpop.f32.mrb[2].mxu0 }
 0x12f   :  { %183 = vst [vmem:[#allocation8 + $0x10] sm:$0xff] %v175_v16  ;;  %v178_v20 = vadd.f32 %v241_v19, %v203_v14  ;;  %v169_v21 = vpop.f32.mrb[3].mxu0 }
 0x130   :  { %181 = vst [vmem:[#allocation8] sm:$0xff] %v167_v18  ;;  %v170_v22 = vadd.f32 %v203_v14, %v169_v21 }
 0x131   :  { %184 = vst [vmem:[#allocation8 + $0x18] sm:$0xff] %v178_v20 }
 0x132   :  { %182 = vst [vmem:[#allocation8 + $0x8] sm:$0xff] %v170_v22 }
 0x133   :  { %335 = shalt.err (!%p332_p0)
}
 0x134   :  { %s336_s28 = scalar_lea.hbm %s437_s3, 512 }
 0x135   :  { %p337_p1 = scmp.ne.s32.totalorder %s437_s3, %s336_s28  ;;  %p340_p2 = scmp.lt.u32.totalorder %s336_s28, %s437_s3 }
 0x137   :  { %p342_p3 = pnand %p340_p2, %p337_p1 }
 0x139   :  { %345 = shalt.err (!%p342_p3)
}
 0x13a   :  { %196 = dma.vmem_to_hbm [thread:$0]  %s191_s24, 512, %s437_s3, [#allocation4], %s356_s1, %s356_s1, %s357_s9  }
 0x13b   :  { %350 = dma.done.wait [#allocation4], 512  }
 0x13c   :  { %351 = vsyncadd [#allocation4], 4294966784 }
 0x13d   :  { %200 = vsyncpa [#allocation3], 1 }
 0x13e   :  { %201 = vsyncpa [#allocation6], 1 }
 0x13f   :  { %202 = vsyncpa [#allocation4], 1 }

</bundles_post_ra>
